<compile_context>
chip_gen: v6e
topology: v6e:2x2x1
jax: 0.10.0
libtpu: 0.0.40
codegen_flags: <defaults>
</compile_context>

<pallas_src>
import functools

import jax
import jax.numpy as jnp
from jax.experimental import pallas as pl
from jax.experimental.pallas import tpu as pltpu

# ----------------------------------------------------------------------------
# Problem sizes (from the module: in_channels=10, out_channels=64,
# theta_e2v is 74 -> 64, so S_features has 74 - 64 = 10 columns).
# ----------------------------------------------------------------------------
N, E = 64, 32          # vertices, hyperedges
IN, OUT = 10, 64       # in_channels, out_channels
SD = 74 - OUT          # S_features width (10)
NEG_SLOPE = 0.2        # atten_neg_slope

# ---- fused-projection lane layout (P = X @ Wcat + bcat) ---------------------
COL_X = 0              # theta_x             -> X_init        (lanes   0.. 63)
COL_A = OUT            # folded atten_vertex -> raw score     (lane        64)
COL_V = 128            # theta_vertex        -> X_feat        (lanes 128..191)
COL_P1 = COL_V + OUT   # constant-1 lane (softmax denominator)(lane       192)
COL_G = 256            # theta_v2e_group (group variant only) (lanes 256..319)
COL_G1 = COL_G + OUT   # constant-1 lane (deg_e)              (lane       320)
PACKW = 256            # projection width, default (non-group) path
PACKW_G = 384          # projection width when the group output is requested

# ---- packed parameter-buffer row layout  [PROW, PACKW or PACKW_G] -----------
ROW_W = 0              # rows 0..IN-1 : fused projection weight Wcat
ROW_B = IN             # row  10      : fused projection bias   bcat
ROW_BE = IN + 1        # row  11      : theta_e2v bias (lanes 0..63) | 1.0 (lane 64)
ROW_WE = 16            # rows 16..79  : theta_e2v weight, two 64-row x 65-lane
                       #   blocks: lanes 0..64 act on Y_v2e, lanes 128..192 act
                       #   on the zero-padded S slab (lane 64/192 columns = 0).
COL_WE_S = 128
PROW = ROW_WE + OUT    # 80 rows

# ---- packed per-graph data-buffer lane layout  [N, DATW] --------------------
DCOL_X = 0             # X   at lanes   0..IN-1              (rows 0..N-1)
DCOL_H = 16            # H   at lanes  16..16+E-1            (rows 0..N-1)
DCOL_S = 64            # S   at lanes  64..64+SD-1           (rows 0..E-1)
DCOL_HT = 128          # H^T at lanes 128..128+N-1           (rows 0..E-1)
DATW = DCOL_HT + N     # 192


def _elu(x):
    # ELU(alpha=1); clamp the exp argument so the unused branch never overflows.
    return jnp.where(x > 0, x, jnp.exp(jnp.minimum(x, 0.0)) - 1.0)


def dphgnn_kernel(data_ref, prm_ref, out_ref, grp_ref=None, *, compute_group=False):
    f32 = jnp.float32

    # --- unpack the two VMEM-resident buffers (static, tile-friendly slices) ---
    X = data_ref[:, DCOL_X:DCOL_X + IN]              # [N, IN]
    H = data_ref[:, DCOL_H:DCOL_H + E]               # [N, E]   0/1 incidence
    SB = data_ref[:E, DCOL_S:DCOL_S + OUT]           # [E, OUT] = [S | 0]
    Ht = data_ref[:E, DCOL_HT:DCOL_HT + N]           # [E, N]   incidence transpose

    Wcat = prm_ref[ROW_W:ROW_W + IN, :]              # [IN, W]
    bcat = prm_ref[ROW_B:ROW_B + 1, :]               # [1, W]
    be1 = prm_ref[ROW_BE:ROW_BE + 1, :OUT + 1]       # [1, OUT+1]   (lane OUT == 1)
    We_v = prm_ref[ROW_WE:ROW_WE + OUT, :OUT + 1]    # [OUT, OUT+1] rows acting on Y_v2e
    We_s = prm_ref[ROW_WE:ROW_WE + OUT,
                   COL_WE_S:COL_WE_S + OUT + 1]      # [OUT, OUT+1] rows acting on [S | 0]

    # --- fused theta_x / theta_vertex / folded atten_vertex [/ group] ----------
    # One MXU pass; every consumer below is a static lane slice of P.
    P = jnp.dot(X, Wcat, preferred_element_type=f32) + bcat        # [N, W]
    X_init = P[:, COL_X:COL_X + OUT]                               # theta_x(X)
    score = P[:, COL_A:COL_A + 1]                                  # atten_vertex(theta_vertex(X))

    # --- LeakyReLU(0.2); atten_dropout = identity (eval mode) ------------------
    score = jnp.where(score >= 0, score, NEG_SLOPE * score)

    # --- HG.v2e(X_feat, 'softmax_then_sum', v2e_weight=score[v2e_src]) ---------
    # Per-edge softmax is shift-invariant, so one global max shift is exact.
    # Lane COL_P1 of P is a packed constant 1, so P[:, COL_V:COL_P1+1] * p is
    # [X_feat * p | p] and a SINGLE Ht matmul returns numerator AND denominator.
    p = jnp.exp(score - jnp.max(score, axis=0, keepdims=True))     # [N, 1]
    R = jnp.dot(Ht, P[:, COL_V:COL_P1 + 1] * p,
                preferred_element_type=f32)                        # [E, OUT+1]
    inv_den = pl.reciprocal(jnp.maximum(R[:, OUT:OUT + 1], 1e-20), approx=True)
    Yv2e = _elu(R[:, :OUT] * inv_den)                              # [E, OUT]

    # --- theta_e2v(cat(Y_v2e, S)) as a row-split over packed weight blocks -----
    # Lane OUT of be1 is 1 and lane OUT of both weight blocks is 0, so Y1 comes
    # out as [Y | 1]; the ones column folds deg_v into the next matmul for free.
    Y1 = (jnp.dot(Yv2e, We_v, preferred_element_type=f32)
          + jnp.dot(SB, We_s, preferred_element_type=f32) + be1)   # [E, OUT+1]

    # --- HG.e2v(Y, 'mean'); ELU; residual add ----------------------------------
    # TODO(synk): final Dropout / atten_dropout are identity (eval mode); no RNG.
    R3 = jnp.dot(H, Y1, preferred_element_type=f32)                # [N, OUT+1]
    inv_dv = pl.reciprocal(jnp.maximum(R3[:, OUT:OUT + 1], 1.0), approx=True)
    out_ref[...] = _elu(R3[:, :OUT] * inv_dv) + X_init

    # --- HG.v2e_aggregation_of_group('main', theta_v2e_group(X), 'mean') -------
    # Dead in the module's return value; compiled in only when requested.
    if compute_group:
        # Lane COL_G1 of P is a packed constant 1 -> deg_e comes out of the dot.
        R4 = jnp.dot(Ht, P[:, COL_G:COL_G1 + 1], preferred_element_type=f32)   # [E, OUT+1]
        inv_de = pl.reciprocal(jnp.maximum(R4[:, OUT:OUT + 1], 1.0), approx=True)
        grp_ref[...] = _elu(R4[:, :OUT] * inv_de)


@functools.partial(jax.jit, static_argnames="compute_group")
def dphgnn_conv(data, pbuf, *, compute_group=False):
    """Single graph: one gridless pallas_call, 2 inputs, everything VMEM-resident."""
    vmem = pl.BlockSpec(memory_space=pltpu.MemorySpace.VMEM)
    if compute_group:
        out_shape = (jax.ShapeDtypeStruct((N, OUT), jnp.float32),
                     jax.ShapeDtypeStruct((E, OUT), jnp.float32))
        out_specs = (vmem, vmem)
    else:
        out_shape = jax.ShapeDtypeStruct((N, OUT), jnp.float32)
        out_specs = vmem
    kernel = functools.partial(dphgnn_kernel, compute_group=compute_group)
    return pl.pallas_call(
        kernel,
        out_shape=out_shape,
        in_specs=[vmem, vmem],
        out_specs=out_specs,
    )(data, pbuf)


@jax.jit
def dphgnn_conv_batched(data_b, pbuf):
    """Batched graphs on a 'parallel' grid axis (v7x: shards across both TCs).

    The parameter BlockSpec has a constant index_map, so weights stay
    VMEM-resident across grid steps; per-graph data/output blocks are indexed
    by the grid position.
    """
    B = data_b.shape[0]
    # Note: for large B, pack two graphs' OUT=64 outputs per 128-lane block
    # (lane-dense writeback) instead of a 64-lane last dim per block.
    return pl.pallas_call(
        dphgnn_kernel,
        out_shape=jax.ShapeDtypeStruct((B, N, OUT), jnp.float32),
        grid=(B,),
        in_specs=[pl.BlockSpec((None, N, DATW), lambda g: (g, 0, 0)),
                  pl.BlockSpec((PROW, pbuf.shape[1]), lambda g: (0, 0))],
        out_specs=pl.BlockSpec((None, N, OUT), lambda g: (g, 0, 0)),
        compiler_params=pltpu.CompilerParams(dimension_semantics=("parallel",)),
    )(data_b, pbuf)


def init_params(key):
    """Deterministic PyTorch-Linear-style init (uniform +/- 1/sqrt(fan_in))."""
    def linear(k, fan_in, fan_out):
        kw, kb = jax.random.split(k)
        bound = 1.0 / jnp.sqrt(jnp.float32(fan_in))
        w = jax.random.uniform(kw, (fan_in, fan_out), jnp.float32, -bound, bound)
        b = jax.random.uniform(kb, (1, fan_out), jnp.float32, -bound, bound)
        return w, b

    ks = jax.random.split(key, 5)
    wx, bx = linear(ks[0], IN, OUT)            # theta_x
    wv, bv = linear(ks[1], IN, OUT)            # theta_vertex
    wg, bg = linear(ks[2], IN, OUT)            # theta_v2e_group
    we, be = linear(ks[3], OUT + SD, OUT)      # theta_e2v (74 -> 64)
    bound_a = 1.0 / jnp.sqrt(jnp.float32(OUT))
    watt = jax.random.uniform(ks[4], (OUT, 1), jnp.float32, -bound_a, bound_a)  # no bias
    return dict(wx=wx, bx=bx, wv=wv, bv=bv, wg=wg, bg=bg, we=we, be=be, watt=watt)


def pack_params(prm):
    """Host-side, once: fuse projections, fold atten_vertex, pad theta_e2v, and
    plant the constant-1 lanes that fold softmax-denominator / deg_v / deg_e
    into matmuls that already exist."""
    def build(width, with_group):
        buf = jnp.zeros((PROW, width), jnp.float32)
        # fused projection weight + bias
        buf = buf.at[ROW_W:ROW_W + IN, COL_X:COL_X + OUT].set(prm["wx"])
        buf = buf.at[ROW_W:ROW_W + IN, COL_A:COL_A + 1].set(prm["wv"] @ prm["watt"])
        buf = buf.at[ROW_W:ROW_W + IN, COL_V:COL_V + OUT].set(prm["wv"])
        buf = buf.at[ROW_B, COL_X:COL_X + OUT].set(prm["bx"][0])
        buf = buf.at[ROW_B, COL_A].set((prm["bv"] @ prm["watt"])[0, 0])
        buf = buf.at[ROW_B, COL_V:COL_V + OUT].set(prm["bv"][0])
        buf = buf.at[ROW_B, COL_P1].set(1.0)                    # ones lane -> softmax denom
        # theta_e2v: bias (with the deg_v ones lane) + row-split weight blocks
        buf = buf.at[ROW_BE, :OUT].set(prm["be"][0])
        buf = buf.at[ROW_BE, OUT].set(1.0)                      # ones lane -> deg_v
        buf = buf.at[ROW_WE:ROW_WE + OUT, :OUT].set(prm["we"][:OUT])
        buf = buf.at[ROW_WE:ROW_WE + SD, COL_WE_S:COL_WE_S + OUT].set(prm["we"][OUT:])
        if with_group:
            buf = buf.at[ROW_W:ROW_W + IN, COL_G:COL_G + OUT].set(prm["wg"])
            buf = buf.at[ROW_B, COL_G:COL_G + OUT].set(prm["bg"][0])
            buf = buf.at[ROW_B, COL_G1].set(1.0)                # ones lane -> deg_e
        return buf

    return dict(pbuf=build(PACKW, False), pbuf_g=build(PACKW_G, True))


def pack_inputs(X, H, S_features):
    """Host-side, once per graph: pack X | H | S | H^T into one buffer (1 DMA)."""
    data = jnp.zeros((N, DATW), jnp.float32)
    data = data.at[:, DCOL_X:DCOL_X + IN].set(X)
    data = data.at[:, DCOL_H:DCOL_H + E].set(H)
    data = data.at[:E, DCOL_S:DCOL_S + SD].set(S_features)
    data = data.at[:E, DCOL_HT:DCOL_HT + N].set(H.T)
    return data


def dphgnn_ref(X, H, S_features, prm):
    """Plain-JAX reference of DPHGNNConv.forward (eval, use_bn=False, is_last=False)."""
    X_init = X @ prm["wx"] + prm["bx"]
    X_feat = X @ prm["wv"] + prm["bv"]
    s = X_feat @ prm["watt"]                                   # [N, 1]
    s = jnp.where(s >= 0, s, NEG_SLOPE * s)                    # LeakyReLU; dropout = id
    w = H * jnp.exp(s - jnp.max(s))                            # [N, E]
    z = w / jnp.maximum(jnp.sum(w, axis=0, keepdims=True), 1e-20)
    Yv2e = jax.nn.elu(z.T @ X_feat)                            # softmax_then_sum + ELU
    Y = jnp.concatenate([Yv2e, S_features], axis=1) @ prm["we"] + prm["be"]
    deg_v = jnp.maximum(jnp.sum(H, axis=1, keepdims=True), 1.0)
    out = jax.nn.elu((H @ Y) / deg_v) + X_init                 # e2v mean + ELU + residual
    X_grp = X @ prm["wg"] + prm["bg"]
    deg_e = jnp.maximum(jnp.sum(H, axis=0, keepdims=True).T, 1.0)
    grp = jax.nn.elu((H.T @ X_grp) / deg_e)
    return out, grp


if __name__ == "__main__":
    key = jax.random.PRNGKey(0)
    kx, kh, ks, kx2, kh2, ks2, kp = jax.random.split(key, 7)

    def make_graph(kx_, kh_, ks_):
        X = jax.random.normal(kx_, (N, IN), jnp.float32)
        S = jax.random.normal(ks_, (E, SD), jnp.float32)
        H = jax.random.bernoulli(kh_, 0.3, (N, E)).astype(jnp.float32)
        # guarantee every vertex / hyperedge is non-empty (kernel also guards)
        H = jnp.maximum(H, jax.nn.one_hot(jnp.arange(N) % E, E, dtype=jnp.float32))
        return X, H, S

    X, H, S = make_graph(kx, kh, ks)
    X2, H2, S2 = make_graph(kx2, kh2, ks2)

    prm = init_params(kp)
    packed = pack_params(prm)
    data = pack_inputs(X, H, S)
    data2 = pack_inputs(X2, H2, S2)

    # default (optimized) path: dead group branch skipped, 256-lane projection
    X_out = jax.block_until_ready(dphgnn_conv(data, packed["pbuf"]))
    assert X_out.shape == (N, OUT)
    assert bool(jnp.all(jnp.isfinite(X_out)))

    # optional group branch (matches the module's full forward body)
    X_out_g, Y_grp = jax.block_until_ready(
        dphgnn_conv(data, packed["pbuf_g"], compute_group=True))
    assert Y_grp.shape == (E, OUT)
    assert bool(jnp.all(jnp.isfinite(Y_grp)))
    assert bool(jnp.allclose(X_out, X_out_g, atol=1e-5, rtol=1e-5))

    # plain-JAX reference check (loose tolerance: default-precision bf16 MXU
    # passes + approx-reciprocal EUP divides in the kernel)
    X_ref, grp_ref_val = dphgnn_ref(X, H, S, prm)
    assert bool(jnp.allclose(X_out, X_ref, atol=5e-2, rtol=5e-2))
    assert bool(jnp.allclose(Y_grp, grp_ref_val, atol=5e-2, rtol=5e-2))

    # batched path (v7x: 'parallel' grid axis, VMEM-resident params)
    batch = jnp.stack([data, data2])
    X_out_b = jax.block_until_ready(dphgnn_conv_batched(batch, packed["pbuf"]))
    assert X_out_b.shape == (2, N, OUT)
    assert bool(jnp.allclose(X_out_b[0], X_out, atol=1e-5, rtol=1e-5))
    X_out2 = jax.block_until_ready(dphgnn_conv(data2, packed["pbuf"]))
    assert bool(jnp.allclose(X_out_b[1], X_out2, atol=1e-5, rtol=1e-5))

    print("KERNEL_OK")
</pallas_src>

<mosaic_0001>
module attributes {stable_mosaic.version = 11 : i64} {
  func.func @dphgnn_kernel(%arg0: memref<64x192xf32, #tpu.memory_space<vmem>>, %arg1: memref<80x256xf32, #tpu.memory_space<vmem>>, %arg2: memref<64x64xf32, #tpu.memory_space<vmem>>) attributes {dimension_semantics = [], scalar_prefetch = 0 : i64, scratch_operands = 0 : i64, tpu.core_type = #tpu.core_type<tc>} {
    %c0 = arith.constant 0 : index
    %c0_0 = arith.constant 0 : index
    %0 = vector.load %arg0[%c0, %c0_0] : memref<64x192xf32, #tpu.memory_space<vmem>>, vector<64x10xf32>
    %c0_1 = arith.constant 0 : index
    %c16 = arith.constant 16 : index
    %1 = vector.load %arg0[%c0_1, %c16] : memref<64x192xf32, #tpu.memory_space<vmem>>, vector<64x32xf32>
    %c0_2 = arith.constant 0 : index
    %c64 = arith.constant 64 : index
    %2 = vector.load %arg0[%c0_2, %c64] : memref<64x192xf32, #tpu.memory_space<vmem>>, vector<32x64xf32>
    %c0_3 = arith.constant 0 : index
    %c128 = arith.constant 128 : index
    %3 = vector.load %arg0[%c0_3, %c128] : memref<64x192xf32, #tpu.memory_space<vmem>>, vector<32x64xf32>
    %c0_4 = arith.constant 0 : index
    %c0_5 = arith.constant 0 : index
    %4 = vector.load %arg1[%c0_4, %c0_5] : memref<80x256xf32, #tpu.memory_space<vmem>>, vector<10x256xf32>
    %c10 = arith.constant 10 : index
    %c0_6 = arith.constant 0 : index
    %5 = vector.load %arg1[%c10, %c0_6] : memref<80x256xf32, #tpu.memory_space<vmem>>, vector<1x256xf32>
    %c11 = arith.constant 11 : index
    %c0_7 = arith.constant 0 : index
    %6 = vector.load %arg1[%c11, %c0_7] : memref<80x256xf32, #tpu.memory_space<vmem>>, vector<1x65xf32>
    %c16_8 = arith.constant 16 : index
    %c0_9 = arith.constant 0 : index
    %7 = vector.load %arg1[%c16_8, %c0_9] : memref<80x256xf32, #tpu.memory_space<vmem>>, vector<64x65xf32>
    %c16_10 = arith.constant 16 : index
    %c128_11 = arith.constant 128 : index
    %8 = vector.load %arg1[%c16_10, %c128_11] : memref<80x256xf32, #tpu.memory_space<vmem>>, vector<64x65xf32>
    %cst = arith.constant dense<0.000000e+00> : vector<64x256xf32>
    %9 = tpu.matmul %0, %4, %cst {dimension_numbers = #tpu.dot_dimension_numbers<[1], [0], [0], [1], [0, 0, 1, 1], [], []>} : vector<64x10xf32>, vector<10x256xf32>, vector<64x256xf32> -> vector<64x256xf32>
    %10 = vector.broadcast %5 : vector<1x256xf32> to vector<64x256xf32>
    %11 = arith.addf %9, %10 : vector<64x256xf32>
    %12 = vector.extract_strided_slice %11 {offsets = [0, 0], sizes = [64, 64], strides = [1, 1]} : vector<64x256xf32> to vector<64x64xf32>
    %13 = vector.extract_strided_slice %11 {offsets = [0, 64], sizes = [64, 1], strides = [1, 1]} : vector<64x256xf32> to vector<64x1xf32>
    %cst_12 = arith.constant 0.000000e+00 : f32
    %14 = vector.broadcast %cst_12 : f32 to vector<64x1xf32>
    %15 = arith.cmpf oge, %13, %14 : vector<64x1xf32>
    %cst_13 = arith.constant 2.000000e-01 : f32
    %16 = vector.broadcast %cst_13 : f32 to vector<64x1xf32>
    %17 = arith.mulf %16, %13 : vector<64x1xf32>
    %18 = arith.select %15, %13, %17 : vector<64x1xi1>, vector<64x1xf32>
    %cst_14 = arith.constant dense<0xFF800000> : vector<1xf32>
    %19 = vector.multi_reduction <maximumf>, %18, %cst_14 [0] : vector<64x1xf32> to vector<1xf32>
    %20 = vector.shape_cast %19 : vector<1xf32> to vector<1x1xf32>
    %21 = vector.broadcast %20 : vector<1x1xf32> to vector<64x1xf32>
    %22 = arith.subf %18, %21 : vector<64x1xf32>
    %23 = math.exp %22 : vector<64x1xf32>
    %24 = vector.extract_strided_slice %11 {offsets = [0, 128], sizes = [64, 65], strides = [1, 1]} : vector<64x256xf32> to vector<64x65xf32>
    %25 = vector.broadcast %23 : vector<64x1xf32> to vector<64x65xf32>
    %26 = arith.mulf %24, %25 : vector<64x65xf32>
    %cst_15 = arith.constant dense<0.000000e+00> : vector<32x65xf32>
    %27 = tpu.matmul %3, %26, %cst_15 {dimension_numbers = #tpu.dot_dimension_numbers<[1], [0], [0], [1], [0, 0, 1, 1], [], []>} : vector<32x64xf32>, vector<64x65xf32>, vector<32x65xf32> -> vector<32x65xf32>
    %28 = vector.extract_strided_slice %27 {offsets = [0, 64], sizes = [32, 1], strides = [1, 1]} : vector<32x65xf32> to vector<32x1xf32>
    %cst_16 = arith.constant 9.99999968E-21 : f32
    %29 = vector.broadcast %cst_16 : f32 to vector<32x1xf32>
    %30 = arith.maximumf %28, %29 : vector<32x1xf32>
    %31 = tpu.reciprocal %30 {approx = true} : vector<32x1xf32> -> vector<32x1xf32>
    %32 = vector.extract_strided_slice %27 {offsets = [0, 0], sizes = [32, 64], strides = [1, 1]} : vector<32x65xf32> to vector<32x64xf32>
    %33 = vector.broadcast %31 : vector<32x1xf32> to vector<32x64xf32>
    %34 = arith.mulf %32, %33 : vector<32x64xf32>
    %cst_17 = arith.constant 0.000000e+00 : f32
    %35 = vector.broadcast %cst_17 : f32 to vector<32x64xf32>
    %36 = arith.cmpf ogt, %34, %35 : vector<32x64xf32>
    %cst_18 = arith.constant 0.000000e+00 : f32
    %37 = vector.broadcast %cst_18 : f32 to vector<32x64xf32>
    %38 = arith.minimumf %34, %37 : vector<32x64xf32>
    %39 = math.exp %38 : vector<32x64xf32>
    %cst_19 = arith.constant 1.000000e+00 : f32
    %40 = vector.broadcast %cst_19 : f32 to vector<32x64xf32>
    %41 = arith.subf %39, %40 : vector<32x64xf32>
    %42 = arith.select %36, %34, %41 : vector<32x64xi1>, vector<32x64xf32>
    %cst_20 = arith.constant dense<0.000000e+00> : vector<32x65xf32>
    %43 = tpu.matmul %42, %7, %cst_20 {dimension_numbers = #tpu.dot_dimension_numbers<[1], [0], [0], [1], [0, 0, 1, 1], [], []>} : vector<32x64xf32>, vector<64x65xf32>, vector<32x65xf32> -> vector<32x65xf32>
    %cst_21 = arith.constant dense<0.000000e+00> : vector<32x65xf32>
    %44 = tpu.matmul %2, %8, %cst_21 {dimension_numbers = #tpu.dot_dimension_numbers<[1], [0], [0], [1], [0, 0, 1, 1], [], []>} : vector<32x64xf32>, vector<64x65xf32>, vector<32x65xf32> -> vector<32x65xf32>
    %45 = arith.addf %43, %44 : vector<32x65xf32>
    %46 = vector.broadcast %6 : vector<1x65xf32> to vector<32x65xf32>
    %47 = arith.addf %45, %46 : vector<32x65xf32>
    %cst_22 = arith.constant dense<0.000000e+00> : vector<64x65xf32>
    %48 = tpu.matmul %1, %47, %cst_22 {dimension_numbers = #tpu.dot_dimension_numbers<[1], [0], [0], [1], [0, 0, 1, 1], [], []>} : vector<64x32xf32>, vector<32x65xf32>, vector<64x65xf32> -> vector<64x65xf32>
    %49 = vector.extract_strided_slice %48 {offsets = [0, 64], sizes = [64, 1], strides = [1, 1]} : vector<64x65xf32> to vector<64x1xf32>
    %cst_23 = arith.constant 1.000000e+00 : f32
    %50 = vector.broadcast %cst_23 : f32 to vector<64x1xf32>
    %51 = arith.maximumf %49, %50 : vector<64x1xf32>
    %52 = tpu.reciprocal %51 {approx = true} : vector<64x1xf32> -> vector<64x1xf32>
    %53 = vector.extract_strided_slice %48 {offsets = [0, 0], sizes = [64, 64], strides = [1, 1]} : vector<64x65xf32> to vector<64x64xf32>
    %54 = vector.broadcast %52 : vector<64x1xf32> to vector<64x64xf32>
    %55 = arith.mulf %53, %54 : vector<64x64xf32>
    %cst_24 = arith.constant 0.000000e+00 : f32
    %56 = vector.broadcast %cst_24 : f32 to vector<64x64xf32>
    %57 = arith.cmpf ogt, %55, %56 : vector<64x64xf32>
    %cst_25 = arith.constant 0.000000e+00 : f32
    %58 = vector.broadcast %cst_25 : f32 to vector<64x64xf32>
    %59 = arith.minimumf %55, %58 : vector<64x64xf32>
    %60 = math.exp %59 : vector<64x64xf32>
    %cst_26 = arith.constant 1.000000e+00 : f32
    %61 = vector.broadcast %cst_26 : f32 to vector<64x64xf32>
    %62 = arith.subf %60, %61 : vector<64x64xf32>
    %63 = arith.select %57, %55, %62 : vector<64x64xi1>, vector<64x64xf32>
    %64 = arith.addf %63, %12 : vector<64x64xf32>
    %c0_27 = arith.constant 0 : index
    %c0_28 = arith.constant 0 : index
    %65 = vector.load %arg2[%c0_27, %c0_28] : memref<64x64xf32, #tpu.memory_space<vmem>>, vector<64x64xf32>
    tpu.vector_store %arg2[%c0_27, %c0_28], %64 {strides = array<i32>} : memref<64x64xf32, #tpu.memory_space<vmem>>, vector<64x64xf32>,
    return
  }
}

</mosaic_0001>

<bundles_post_ra>
// kernel: dphgnn_conv.1
= control target key start
LH: loop header
LB: loop body
LE: loop exit
PB: predicated region body
PF: predicated region fallthrough
CT: control target
= control target key end

     0   :  { %7 = vsyncpa [#allocation3], 0  ;;  %s1526_s0 = inlined_call_operand.hbm [shape: f32[64,192], index: 0, kind: input, shape index: {}]   ;;  %s1527_s1 = inlined_call_operand.hbm [shape: f32[80,256], index: 1, kind: input, shape index: {}]   ;;  %s1528_s2 = inlined_call_operand.hbm [shape: f32[64,64], index: 2, kind: output, shape index: {}]  }
   0x1   :  { %8 = vsyncpa [#allocation6], 0 }
   0x2   :  { %9 = vsyncpa [#allocation4], 0  ;;  %s1316_s9 = smov [#allocation2]  }
   0x3   :  { %s15_s10 = sshll.u32 %s1316_s9, 4  ;;  %s16_s10 = int_to_ptr.vmem [resolvable:$true] %s15_s10 }
   0x4   :  { %s1258_s11 = scalar_lea.vmem %s16_s10, 2048  ;;  %p1263_p1 = scmp.lt.s32.totalorder %s16_s10, %s16_s10 }
   0x5   :  { %p1259_p0 = scmp.ne.s32.totalorder %s16_s10, %s1258_s11  ;;  %p1264_p2 = scmp.lt.s32.totalorder %s1258_s11, %s1258_s11 }
   0x7   :  { %p1265_p3 = por %p1264_p2, %p1263_p1 }
   0x9   :  { %p1266_p4 = pnand %p1265_p3, %p1259_p0 }
   0xb   :  { %1269 = shalt.err (!%p1266_p4)
}
   0xc   :  { %s1317_s12 = smov 256   ;;  %s1318_s13 = smov 16  }
   0xd   :  { %21 = dma.hbm_to_vmem [thread:$0]  %s1526_s0, 2048, %s16_s10, [#allocation3], %s1317_s12, %s1317_s12, %s1318_s13  }
   0xe   :  { %s1319_s16 = smov [#allocation5]  }
   0xf   :  { %s27_s17 = sshll.u32 %s1319_s16, 4  ;;  %s28_s17 = int_to_ptr.vmem [resolvable:$true] %s27_s17 }
  0x10   :  { %s1278_s18 = scalar_lea.vmem %s28_s17, 2560  ;;  %p1283_p6 = scmp.lt.s32.totalorder %s28_s17, %s28_s17 }
  0x11   :  { %p1279_p5 = scmp.ne.s32.totalorder %s28_s17, %s1278_s18  ;;  %p1284_p7 = scmp.lt.s32.totalorder %s1278_s18, %s1278_s18 }
  0x13   :  { %p1285_p8 = por %p1284_p7, %p1283_p6 }
  0x15   :  { %p1286_p9 = pnand %p1285_p8, %p1279_p5 }
  0x17   :  { %1289 = shalt.err (!%p1286_p9)
}
  0x18   :  { %33 = dma.hbm_to_vmem [thread:$0]  %s1527_s1, 2560, %s28_s17, [#allocation6], %s1317_s12, %s1317_s12, %s1318_s13  }
  0x19   :  { %1310 = dma.done.wait [#allocation3], 2048  }
  0x1a   :  { %1311 = vsyncadd [#allocation3], 4294965248 }
  0x1b   :  { %1312 = dma.done.wait [#allocation6], 2560  }
  0x1c   :  { %1313 = vsyncadd [#allocation6], 4294964736  ;;  %v1320_v0 = vmov 0.0   ;;  %vm111_vm0 = vcmask 1041408   ;;  %v55_v1 = vld [vmem:[#allocation5 + $0x18] sm:$0x3]  ;;  %v76_v17 = vlaneseq }
  0x1d   :  { %182 = vmatprep.mubr.f32.mxu0 %v1320_v0  ;;  %v54_v2 = vld [vmem:[#allocation5 + $0x10] sm:$0x3]  ;;  %v53_v3 = vld [vmem:[#allocation5 + $0x8] sm:$0xff]  ;;  %989 = vmatprep.subr.msk.mxu0 %vm111_vm0, %v55_v1  ;;  %v52_v4 = vld [vmem:[#allocation5] sm:$0xff]  ;;  %vm86_vm1 = vcmask 80896   ;;  %v1321_v13 = vmov 64  }
  0x1e   :  { %990 = vmatpush1.msk.msra.mxu0 %vm111_vm0, %v54_v2  ;;  %v1348_v5 = vld [vmem:[#allocation2] sm:$0xff]  ;;  %v1352_v6 = vld [vmem:[#allocation2 + $0x10] sm:$0xff]  ;;  %1185 = vset.pattern.permute.xlu1 %v1321_v13  ;;  %v1384_v20 = vshrl.u32 %v76_v17, 7  ;;  %vm255_vm7 = vcmask 531968   ;;  %vm349_vm11 = vcmask 523264   ;;  %s1322_s0 = smov 64  }
  0x1f   :  { %148 = vmatprep.subr.mxu0 %v53_v3  ;;  %v1356_v7 = vld [vmem:[#allocation2 + $0x20] sm:$0xff]  ;;  %v1360_v8 = vld [vmem:[#allocation2 + $0x30] sm:$0xff]  ;;  %1184 = vset.pattern.permute.xlu0 %v1321_v13  ;;  %s1323_s1 = smov 112   ;;  %vm721_vm0 = vcmask 261120   ;;  %s1324_s21 = smov [#allocation7]  }
  0x20   :  { %149 = vmatpush1.msra.mxu0 %v52_v4  ;;  %v1364_v9 = vld [vmem:[#allocation2 + $0x40] sm:$0xff]  ;;  %v1368_v10 = vld [vmem:[#allocation2 + $0x50] sm:$0xff]  ;;  %v78_v23 = vsub.s32 0, %v1384_v20  ;;  %s976_s22 = sshll.u32 %s1324_s21, 4  ;;  %s977_s22 = int_to_ptr.vmem [resolvable:$true] %s976_s22 }
  0x21   :  { %991 = vmatmul.mubr.msk.f32.vlgmr.msra.gmra.mxu0 %vm86_vm1, %v1348_v5  ;;  %v1372_v11 = vld [vmem:[#allocation2 + $0x60] sm:$0xff]  ;;  %v1376_v12 = vld [vmem:[#allocation2 + $0x70] sm:$0xff]  ;;  %s1290_s23 = scalar_lea.vmem %s977_s22, 1024  ;;  %p1295_p11 = scmp.lt.s32.totalorder %s977_s22, %s977_s22 }
  0x22   :  { %188 = vmatprep.mubr.f32.mxu0 %v1320_v0  ;;  %v1389_v24 = vld [vmem:[#allocation5 + $0x12] ss:$8 sm:$0x3]  ;;  %p1291_p10 = scmp.ne.s32.totalorder %s977_s22, %s1290_s23  ;;  %p1296_p12 = scmp.lt.s32.totalorder %s1290_s23, %s1290_s23 }
  0x23   :  { %v79_v27 = vrot.slane %v1389_v24, %v78_v23 }
  0x24   :  { %p1297_p13 = por %p1296_p12, %p1295_p11 }
  0x25   :  { %992 = vmatmul.mubr.msk.f32.gmra.mxu0 %vm86_vm1, %v1352_v6 }
  0x26   :  { %194 = vmatprep.mubr.f32.mxu0 %v1320_v0  ;;  %p1298_p0 = pnand %p1297_p13, %p1291_p10 }
  0x29   :  { %993 = vmatmul.mubr.msk.f32.gmra.mxu0 %vm86_vm1, %v1356_v7 }
  0x2a   :  { %200 = vmatprep.mubr.f32.mxu0 %v1320_v0 }
  0x2d   :  { %994 = vmatmul.mubr.msk.f32.gmra.mxu0 %vm86_vm1, %v1360_v8 }
  0x2e   :  { %206 = vmatprep.mubr.f32.mxu0 %v1320_v0 }
  0x31   :  { %995 = vmatmul.mubr.msk.f32.gmra.mxu0 %vm86_vm1, %v1364_v9 }
  0x32   :  { %212 = vmatprep.mubr.f32.mxu0 %v1320_v0 }
  0x35   :  { %996 = vmatmul.mubr.msk.f32.gmra.mxu0 %vm86_vm1, %v1368_v10 }
  0x36   :  { %218 = vmatprep.mubr.f32.mxu0 %v1320_v0 }
  0x39   :  { %997 = vmatmul.mubr.msk.f32.gmra.mxu0 %vm86_vm1, %v1372_v11 }
  0x3a   :  { %224 = vmatprep.mubr.f32.mxu0 %v1320_v0 }
  0x3d   :  { %998 = vmatmul.mubr.msk.f32.gmra.mxu0 %vm86_vm1, %v1376_v12 }
  0xe1   :  { %v184_v14 = vpop.f32.mrf.mxu0 }
  0xe2   :  { %v1396_v30 = vadd.f32 %v184_v14, %v79_v27 }
  0xe3   :  { %v1380_v15 = vpop.f32.mrf.mxu0 }
  0xe4   :  { %vm231_vm3 = vcmp.ge.f32.partialorder %v1396_v30, 0.0  ;;  %v239_v42 = vmul.f32 0.2, %v1396_v30 }
  0xe5   :  { %v190_v16 = vpop.f32.mrf.mxu0 }
  0xe6   :  { %v1398_v31 = vadd.f32 %v190_v16, %v79_v27  ;;  %v247_v53 = vsel %vm231_vm3, %v1396_v30, %v239_v42 }
  0xe7   :  { %v1382_v18 = vpop.f32.mrf.mxu0  ;;  %v256_v63 = vsel %vm255_vm7, %v247_v53, -inf }
  0xe8   :  { %v240_v39 = vmul.f32 0.2, %v1398_v31  ;;  %vm232_vm4 = vcmp.ge.f32.partialorder %v1398_v31, 0.0 }
  0xe9   :  { %v196_v19 = vpop.f32.mrf.mxu0 }
  0xea   :  { %v1404_v34 = vadd.f32 %v196_v19, %v79_v27  ;;  %v248_v49 = vsel %vm232_vm4, %v1398_v31, %v240_v39 }
  0xeb   :  { %v1386_v21 = vpop.f32.mrf.mxu0  ;;  %v257_v58 = vsel %vm255_vm7, %v248_v49, -inf }
  0xec   :  { %v241_v43 = vmul.f32 0.2, %v1404_v34  ;;  %vm233_vm8 = vcmp.ge.f32.partialorder %v1404_v34, 0.0 }
  0xed   :  { %v202_v22 = vpop.f32.mrf.mxu0 }
  0xee   :  { %v1408_v36 = vadd.f32 %v202_v22, %v79_v27  ;;  %v249_v55 = vsel %vm233_vm8, %v1404_v34, %v241_v43 }
  0xef   :  { %v1391_v25 = vpop.f32.mrf.mxu0  ;;  %v258_v0 = vsel %vm255_vm7, %v249_v55, -inf }
  0xf0   :  { %v242_v45 = vmul.f32 0.2, %v1408_v36  ;;  %vm234_vm9 = vcmp.ge.f32.partialorder %v1408_v36, 0.0 }
  0xf1   :  { %v208_v26 = vpop.f32.mrf.mxu0 }
  0xf2   :  { %v1400_v32 = vadd.f32 %v208_v26, %v79_v27  ;;  %v250_v56 = vsel %vm234_vm9, %v1408_v36, %v242_v45 }
  0xf3   :  { %v1394_v28 = vpop.f32.mrf.mxu0  ;;  %v259_v1 = vsel %vm255_vm7, %v250_v56, -inf }
  0xf4   :  { %v243_v40 = vmul.f32 0.2, %v1400_v32  ;;  %vm235_vm5 = vcmp.ge.f32.partialorder %v1400_v32, 0.0 }
  0xf5   :  { %v214_v29 = vpop.f32.mrf.mxu0 }
  0xf6   :  { %v1402_v33 = vadd.f32 %v214_v29, %v79_v27  ;;  %v251_v50 = vsel %vm235_vm5, %v1400_v32, %v243_v40 }
  0xf7   :  { %v1406_v35 = vpop.f32.mrf.mxu0  ;;  %v260_v59 = vsel %vm255_vm7, %v251_v50, -inf }
  0xf8   :  { %v244_v37 = vmul.f32 0.2, %v1402_v33  ;;  %vm236_vm2 = vcmp.ge.f32.partialorder %v1402_v33, 0.0  ;;  %v261_v3 = vmax.f32 %v256_v63, %v260_v59 }
  0xf9   :  { %v220_v38 = vpop.f32.mrf.mxu0 }
  0xfa   :  { %v1415_v41 = vadd.f32 %v220_v38, %v79_v27  ;;  %v252_v46 = vsel %vm236_vm2, %v1402_v33, %v244_v37 }
  0xfb   :  { %v1421_v44 = vpop.f32.mrf.mxu0  ;;  %v262_v54 = vsel %vm255_vm7, %v252_v46, -inf }
  0xfc   :  { %vm237_vm6 = vcmp.ge.f32.partialorder %v1415_v41, 0.0  ;;  %v245_v47 = vmul.f32 0.2, %v1415_v41  ;;  %v263_v61 = vmax.f32 %v257_v58, %v262_v54 }
  0xfd   :  { %v226_v48 = vpop.f32.mrf.mxu0 }
  0xfe   :  { %v253_v51 = vsel %vm237_vm6, %v1415_v41, %v245_v47  ;;  %v1432_v52 = vadd.f32 %v226_v48, %v79_v27  ;;  %v268_v14 = vmax.f32 %v261_v3, %v263_v61 }
  0xff   :  { %v264_v60 = vsel %vm255_vm7, %v253_v51, -inf }
 0x100   :  { %vm238_vm10 = vcmp.ge.f32.partialorder %v1432_v52, 0.0  ;;  %v246_v57 = vmul.f32 0.2, %v1432_v52  ;;  %v265_v4 = vmax.f32 %v258_v0, %v264_v60  ;;  %v48_v0 = vld [vmem:[#allocation2 + $0x8] sm:$0xff] }
 0x101   :  { %1095 = vmatprep.mubr.msk.f32.mxu1 %vm349_vm11, %v48_v0  ;;  %v64_v0 = vld [vmem:[#allocation5 + $0x70] sm:$0xff] }
 0x102   :  { %v254_v62 = vsel %vm238_vm10, %v1432_v52, %v246_v57 }
 0x103   :  { %v266_v2 = vsel %vm255_vm7, %v254_v62, -inf }
 0x104   :  { %v267_v13 = vmax.f32 %v259_v1, %v266_v2  ;;  %v82_v1 = vsub.s32 1, %v1384_v20  ;;  %v228_v2 = vpop.f32.mrf.mxu0 }
 0x106   :  { %v269_v16 = vmax.f32 %v265_v4, %v267_v13  ;;  %v83_v3 = vrot.slane %v1389_v24, %v82_v1  ;;  %v71_v1 = vld [vmem:[#allocation5 + $0x68] sm:$0xff] }
 0x108   :  { %v270_v17 = vmax.f32 %v268_v14, %v269_v16  ;;  %v229_v4 = vadd.f32 %v228_v2, %v83_v3  ;;  %v205_v24 = vadd.f32 %v1391_v25, %v83_v3  ;;  %v63_v2 = vld [vmem:[#allocation5 + $0x60] sm:$0xff] }
 0x10a   :  { %v271_v19 = vrot.slane %v270_v17, 4 }
 0x10c   :  { %v272_v22 = vmax.f32 %v270_v17, %v271_v19  ;;  %v223_v17 = vadd.f32 %v1421_v44, %v83_v3  ;;  %v199_v44 = vadd.f32 %v1386_v21, %v83_v3  ;;  %v50_v21 = vld [vmem:[#allocation2 + $0x28] sm:$0xff] }
 0x10e   :  { %v273_v23 = vrot.slane %v272_v22, 2 }
 0x110   :  { %v274_v26 = vmax.f32 %v272_v22, %v273_v23  ;;  %v217_v22 = vadd.f32 %v1406_v35, %v83_v3 }
 0x112   :  { %v275_v27 = vrot.slane %v274_v26, 1 }
 0x114   :  { %v276_v29 = vmax.f32 %v274_v26, %v275_v27  ;;  %v211_v27 = vadd.f32 %v1394_v28, %v83_v3 }
 0x116   :  { %v284_v37 = vsub.f32 %v254_v62, %v276_v29  ;;  %v282_v38 = vsub.f32 %v252_v46, %v276_v29  ;;  %v283_v39 = vsub.f32 %v253_v51, %v276_v29  ;;  %v281_v40 = vsub.f32 %v251_v50, %v276_v29 }
 0x117   :  { %v280_v47 = vsub.f32 %v250_v56, %v276_v29  ;;  %v279_v54 = vsub.f32 %v249_v55, %v276_v29  ;;  %v278_v58 = vsub.f32 %v248_v49, %v276_v29  ;;  %v277_v60 = vsub.f32 %v247_v53, %v276_v29 }
 0x118   :  { %v299_v42 = vmul.f32 1.442695, %v284_v37  ;;  %v295_v43 = vmul.f32 1.442695, %v282_v38  ;;  %v297_v45 = vmul.f32 1.442695, %v283_v39 }
 0x119   :  { %v293_v48 = vmul.f32 1.442695, %v281_v40  ;;  %v291_v57 = vmul.f32 1.442695, %v280_v47  ;;  %v289_v59 = vmul.f32 1.442695, %v279_v54  ;;  %v193_v40 = vadd.f32 %v1382_v18, %v83_v3 }
 0x11a   :  { %1186 = vpow2.f32 %v299_v42  ;;  %v287_v61 = vmul.f32 1.442695, %v278_v58  ;;  %v285_v46 = vmul.f32 1.442695, %v277_v60  ;;  %v49_v47 = vld [vmem:[#allocation2 + $0x18] sm:$0xff]  ;;  %v65_v54 = vld [vmem:[#allocation5 + $0x80] sm:$0xff] }
 0x11b   :  { %1188 = vpow2.f32 %v295_v43  ;;  %v187_v43 = vadd.f32 %v1380_v15, %v83_v3  ;;  %v51_v18 = vld [vmem:[#allocation2 + $0x38] sm:$0xff]  ;;  %v62_v3 = vld [vmem:[#allocation5 + $0x50] sm:$0xff] }
 0x11c   :  { %1190 = vpow2.f32 %v297_v45 }
 0x11d   :  { %1192 = vpow2.f32 %v293_v48  ;;  %v66_v48 = vld [vmem:[#allocation5 + $0x90] sm:$0xff] }
 0x11e   :  { %1194 = vpow2.f32 %v291_v57  ;;  %1123 = vmatprep.subr.mxu0 %v66_v48 }
 0x11f   :  { %1196 = vpow2.f32 %v289_v59  ;;  %1124 = vmatpush3.msra.mxu0 %v66_v48 }
 0x120   :  { %1198 = vpow2.f32 %v287_v61  ;;  %1125 = vmatprep.subr.mxu0 %v65_v54 }
 0x121   :  { %1200 = vpow2.f32 %v285_v46  ;;  %1126 = vmatpush3.msra.mxu0 %v65_v54 }
 0x122   :  { %1127 = vmatprep.subr.mxu0 %v64_v0 }
 0x123   :  { %1128 = vmatpush3.msra.mxu0 %v64_v0 }
 0x124   :  { %1129 = vmatprep.subr.mxu0 %v63_v2 }
 0x125   :  { %1130 = vmatpush3.msra.mxu0 %v63_v2 }
 0x126   :  { %1131 = vmatprep.subr.mxu0 %v62_v3 }
 0x127   :  { %v1187_v50 = vpop.eup %1186  ;;  %1132 = vmatpush3.msra.mxu0 %v62_v3 }
 0x128   :  { %v1189_v51 = vpop.eup %1188  ;;  %338 = vperm.xlu0 %1184, %v1187_v50  }
 0x129   :  { %328 = vperm.xlu1 %1185, %v1189_v51   ;;  %v1191_v56 = vpop.eup %1190 }
 0x12a   :  { %v1193_v62 = vpop.eup %1192 }
 0x12b   :  { %v1195_v55 = vpop.eup %1194 }
 0x12c   :  { %333 = vperm.xlu0 %1184, %v1191_v56   ;;  %v1197_v63 = vpop.eup %1196 }
 0x12d   :  { %323 = vperm.xlu1 %1185, %v1193_v62   ;;  %v1199_v49 = vpop.eup %1198 }
 0x12e   :  { %v1201_v53 = vpop.eup %1200 }
 0x130   :  { %318 = vperm.xlu0 %1184, %v1195_v55  }
 0x131   :  { %313 = vperm.xlu1 %1185, %v1197_v63   ;;  %v74_v63 = vld [vmem:[#allocation5 + $0x98] sm:$0xff] }
 0x134   :  { %308 = vperm.xlu0 %1184, %v1199_v49   ;;  %v73_v49 = vld [vmem:[#allocation5 + $0x88] sm:$0xff] }
 0x135   :  { %303 = vperm.xlu1 %1185, %v1201_v53   ;;  %v72_v53 = vld [vmem:[#allocation5 + $0x78] sm:$0xff] }
 0x1a3   :  { %v339_v13 = vpop.permute.xlu0 %338 }
 0x1a4   :  { %v348_v14 = vmul.f32 %v339_v13, %v229_v4  ;;  %v329_v16 = vpop.permute.xlu1 %328  ;;  %v70_v4 = vld [vmem:[#allocation5 + $0x58] sm:$0xff]  ;;  %v69_v13 = vld [vmem:[#allocation5 + $0x48] sm:$0xff] }
 0x1a5   :  { %v346_v29 = vmul.f32 %v329_v16, %v217_v22  ;;  %v68_v16 = vld [vmem:[#allocation5 + $0x38] sm:$0xff]  ;;  %v59_v22 = vld [vmem:[#allocation5 + $0x20] sm:$0xff] }
 0x1a6   :  { %1079 = vmatprep.subr.mxu1 %v348_v14 }
 0x1a7   :  { %1080 = vmatpush3.msra.mxu1 %v348_v14  ;;  %v334_v19 = vpop.permute.xlu0 %333  ;;  %v61_v14 = vld [vmem:[#allocation5 + $0x40] sm:$0xff] }
 0x1a8   :  { %v347_v23 = vmul.f32 %v334_v19, %v223_v17  ;;  %v324_v26 = vpop.permute.xlu1 %323  ;;  %v60_v17 = vld [vmem:[#allocation5 + $0x30] sm:$0xff]  ;;  %1133 = vmatprep.subr.mxu0 %v61_v14  ;;  %v67_v19 = vld [vmem:[#allocation5 + $0x28] sm:$0xff] }
 0x1a9   :  { %v345_v37 = vmul.f32 %v324_v26, %v211_v27  ;;  %1134 = vmatpush3.msra.mxu0 %v61_v14 }
 0x1aa   :  { %1081 = vmatprep.subr.mxu1 %v347_v23  ;;  %1135 = vmatprep.subr.mxu0 %v60_v17 }
 0x1ab   :  { %1082 = vmatpush3.msra.mxu1 %v347_v23  ;;  %v319_v20 = vpop.permute.xlu0 %318  ;;  %1136 = vmatpush3.msra.mxu0 %v60_v17 }
 0x1ac   :  { %v314_v38 = vpop.permute.xlu1 %313  ;;  %1083 = vmatprep.subr.mxu1 %v346_v29  ;;  %v344_v39 = vmul.f32 %v319_v20, %v205_v24  ;;  %1137 = vmatprep.subr.mxu0 %v59_v22 }
 0x1ad   :  { %1084 = vmatpush3.msra.mxu1 %v346_v29  ;;  %v343_v42 = vmul.f32 %v314_v38, %v199_v44  ;;  %1138 = vmatpush3.msra.mxu0 %v59_v22 }
 0x1ae   :  { %1085 = vmatprep.subr.mxu1 %v345_v37 }
 0x1af   :  { %1086 = vmatpush3.msra.mxu1 %v345_v37  ;;  %v309_v35 = vpop.permute.xlu0 %308 }
 0x1b0   :  { %1087 = vmatprep.subr.mxu1 %v344_v39  ;;  %v304_v28 = vpop.permute.xlu1 %303  ;;  %v342_v45 = vmul.f32 %v309_v35, %v193_v40 }
 0x1b1   :  { %1088 = vmatpush3.msra.mxu1 %v344_v39  ;;  %v341_v25 = vmul.f32 %v304_v28, %v187_v43 }
 0x1b2   :  { %1089 = vmatprep.subr.mxu1 %v343_v42 }
 0x1b3   :  { %1090 = vmatpush3.msra.mxu1 %v343_v42 }
 0x1b4   :  { %1091 = vmatprep.subr.mxu1 %v342_v45 }
 0x1b5   :  { %1092 = vmatpush3.msra.mxu1 %v342_v45 }
 0x1b6   :  { %1093 = vmatprep.subr.mxu1 %v341_v25 }
 0x1b7   :  { %1094 = vmatpush3.msra.mxu1 %v341_v25 }
 0x1b8   :  { %1096 = vmatmul.mubr.msk.f32.vlgmr.msra.gmra.mxu1 %vm349_vm11, %v49_v47  ;;  %1101 = vmatprep.subr.mxu1 %v74_v63 }
 0x1b9   :  { %1098 = vmatprep.mubr.msk.f32.mxu1 %vm349_vm11, %v50_v21  ;;  %1102 = vmatpush3.msra.mxu1 %v74_v63 }
 0x1ba   :  { %1103 = vmatprep.subr.mxu1 %v73_v49 }
 0x1bb   :  { %1104 = vmatpush3.msra.mxu1 %v73_v49  ;;  %v58_v49 = vld [vmem:[#allocation5 + $0x13] ss:$0 sm:$0xff] }
 0x1bc   :  { %1099 = vmatmul.mubr.msk.f32.gmra.mxu1 %vm349_vm11, %v51_v18  ;;  %1105 = vmatprep.subr.mxu1 %v72_v53 }
 0x1bd   :  { %1106 = vmatpush3.msra.mxu1 %v72_v53 }
 0x1be   :  { %1107 = vmatprep.subr.mxu1 %v71_v1 }
 0x1bf   :  { %1108 = vmatpush3.msra.mxu1 %v71_v1 }
 0x1c0   :  { %1109 = vmatprep.subr.mxu1 %v70_v4 }
 0x1c1   :  { %1110 = vmatpush3.msra.mxu1 %v70_v4 }
 0x1c2   :  { %1111 = vmatprep.subr.mxu1 %v69_v13 }
 0x1c3   :  { %1112 = vmatpush3.msra.mxu1 %v69_v13 }
 0x1c4   :  { %1113 = vmatprep.subr.mxu1 %v68_v16 }
 0x1c5   :  { %1114 = vmatpush3.msra.mxu1 %v68_v16 }
 0x1c6   :  { %1115 = vmatprep.subr.mxu1 %v67_v19 }
 0x1c7   :  { %1116 = vmatpush3.msra.mxu1 %v67_v19 }
 0x278   :  { %v1463_v15 = vpop.f32.mrf.mxu1 }
 0x279   :  { %v448_v57 = vmax.f32 %v1463_v15, 1e-20 }
 0x27a   :  { %v1466_v58 = vpop.f32.mrf.mxu1 }
 0x27b   :  { %1202 = vrcp.f32 %v448_v57  ;;  %v447_v59 = vmax.f32 %v1466_v58, 1e-20 }
 0x27c   :  { %v1469_v60 = vpop.f32.mrf.mxu1 }
 0x27d   :  { %1204 = vrcp.f32 %v447_v59  ;;  %v450_v61 = vmax.f32 %v1469_v60, 1e-20 }
 0x27e   :  { %v1472_v46 = vpop.f32.mrf.mxu1 }
 0x27f   :  { %1206 = vrcp.f32 %v450_v61  ;;  %v449_v50 = vmax.f32 %v1472_v46, 1e-20 }
 0x281   :  { %1208 = vrcp.f32 %v449_v50 }
 0x288   :  { %v1203_v51 = vpop.eup %1202 }
 0x289   :  { %462 = vperm.xlu1 %1185, %v1203_v51  }
 0x28a   :  { %v1205_v56 = vpop.eup %1204 }
 0x28b   :  { %457 = vperm.xlu0 %1184, %v1205_v56  }
 0x28c   :  { %v1207_v62 = vpop.eup %1206 }
 0x28d   :  { %472 = vperm.xlu1 %1185, %v1207_v62  }
 0x28e   :  { %v1209_v55 = vpop.eup %1208 }
 0x28f   :  { %467 = vperm.xlu0 %1184, %v1209_v55  }
 0x291   :  { %505 = vrot.lane.b32.xlu1 %v1352_v6, %s1322_s0 }
 0x293   :  { %503 = vrot.lane.b32.xlu0 %v1348_v5, %s1322_s0 }
 0x295   :  { %509 = vrot.lane.b32.xlu1 %v1360_v8, %s1322_s0 }
 0x297   :  { %507 = vrot.lane.b32.xlu0 %v1356_v7, %s1322_s0 }
 0x299   :  { %711 = vrot.lane.b32.xlu1 %v1360_v8, %s1323_s1 }
 0x29b   :  { %709 = vrot.lane.b32.xlu0 %v1356_v7, %s1323_s1 }
 0x29d   :  { %715 = vrot.lane.b32.xlu1 %v1368_v10, %s1323_s1 }
 0x29f   :  { %713 = vrot.lane.b32.xlu0 %v1364_v9, %s1323_s1 }
 0x2a1   :  { %717 = vrot.lane.b32.xlu1 %v1372_v11, %s1323_s1 }
 0x2a3   :  { %705 = vrot.lane.b32.xlu0 %v1348_v5, %s1323_s1 }
 0x2a5   :  { %719 = vrot.lane.b32.xlu1 %v1376_v12, %s1323_s1 }
 0x2a7   :  { %707 = vrot.lane.b32.xlu0 %v1352_v6, %s1323_s1 }
 0x304   :  { %v463_v23 = vpop.permute.xlu1 %462 }
 0x305   :  { %v476_v26 = vmul.f32 %v1463_v15, %v463_v23 }
 0x306   :  { %v458_v27 = vpop.permute.xlu0 %457 }
 0x307   :  { %v484_v29 = vmin.f32 %v476_v26, 0.0  ;;  %v475_v7 = vmul.f32 %v458_v27, %v1466_v58  ;;  %vm480_vm13 = vcmp.gt.f32.partialorder %v476_v26, 0.0 }
 0x308   :  { %v473_v8 = vpop.permute.xlu1 %472 }
 0x309   :  { %v489_v20 = vmul.f32 1.442695, %v484_v29  ;;  %v483_v9 = vmin.f32 %v475_v7, 0.0  ;;  %v478_v10 = vmul.f32 %v1469_v60, %v473_v8  ;;  %vm479_vm12 = vcmp.gt.f32.partialorder %v475_v7, 0.0 }
 0x30a   :  { %v468_v24 = vpop.permute.xlu0 %467 }
 0x30b   :  { %1210 = vpow2.f32 %v489_v20  ;;  %v487_v5 = vmul.f32 1.442695, %v483_v9  ;;  %v486_v11 = vmin.f32 %v478_v10, 0.0  ;;  %v477_v6 = vmul.f32 %v468_v24, %v1472_v46 }
 0x30c   :  { %v506_v37 = vpop.permute.xlu1 %505  ;;  %vm482_vm15 = vcmp.gt.f32.partialorder %v478_v10, 0.0 }
 0x30d   :  { %1212 = vpow2.f32 %v487_v5  ;;  %v493_v12 = vmul.f32 1.442695, %v486_v11  ;;  %v485_v38 = vmin.f32 %v477_v6, 0.0  ;;  %vm481_vm14 = vcmp.gt.f32.partialorder %v477_v6, 0.0 }
 0x30e   :  { %v504_v44 = vpop.permute.xlu0 %503 }
 0x30f   :  { %1214 = vpow2.f32 %v493_v12  ;;  %1117 = vmatprep.mubr.msk.f32.mxu1 %vm349_vm11, %v504_v44  ;;  %v491_v39 = vmul.f32 1.442695, %v485_v38 }
 0x310   :  { %1118 = vmatmul.mubr.msk.f32.vlgmr.msra.gmra.mxu1 %vm349_vm11, %v506_v37  ;;  %v510_v35 = vpop.permute.xlu1 %509 }
 0x311   :  { %1216 = vpow2.f32 %v491_v39 }
 0x312   :  { %v508_v40 = vpop.permute.xlu0 %507 }
 0x313   :  { %1120 = vmatprep.mubr.msk.f32.mxu1 %vm349_vm11, %v508_v40 }
 0x314   :  { %1121 = vmatmul.mubr.msk.f32.gmra.mxu1 %vm349_vm11, %v510_v35  ;;  %v712_v55 = vpop.permute.xlu1 %711 }
 0x316   :  { %v710_v58 = vpop.permute.xlu0 %709 }
 0x317   :  { %1156 = vmatprep.mubr.msk.f32.mxu1 %vm721_vm0, %v710_v58 }
 0x318   :  { %v1211_v42 = vpop.eup %1210  ;;  %v716_v14 = vpop.permute.xlu1 %715 }
 0x319   :  { %v1004_v43 = vadd.f32 -1.0, %v1211_v42 }
 0x31a   :  { %v1213_v28 = vpop.eup %1212  ;;  %v714_v59 = vpop.permute.xlu0 %713 }
 0x31b   :  { %v1003_v45 = vadd.f32 -1.0, %v1213_v28  ;;  %v500_v21 = vsel %vm480_vm13, %v476_v26, %v1004_v43 }
 0x31c   :  { %v1215_v25 = vpop.eup %1214  ;;  %v718_v22 = vpop.permute.xlu1 %717 }
 0x31d   :  { %v499_v47 = vsel %vm479_vm12, %v475_v7, %v1003_v45  ;;  %v1006_v48 = vadd.f32 -1.0, %v1215_v25 }
 0x31e   :  { %1139 = vmatprep.mubr.msk.f32.mxu0 %vm349_vm11, %v499_v47  ;;  %v1217_v18 = vpop.eup %1216  ;;  %v706_v60 = vpop.permute.xlu0 %705 }
 0x31f   :  { %1140 = vmatmul.mubr.msk.f32.vlgmr.msra.gmra.mxu0 %vm349_vm11, %v500_v21  ;;  %v1005_v54 = vadd.f32 -1.0, %v1217_v18  ;;  %v502_v57 = vsel %vm482_vm15, %v478_v10, %v1006_v48 }
 0x320   :  { %v720_v23 = vpop.permute.xlu1 %719 }
 0x321   :  { %v501_v15 = vsel %vm481_vm14, %v477_v6, %v1005_v54 }
 0x322   :  { %1142 = vmatprep.mubr.msk.f32.mxu0 %vm349_vm11, %v501_v15  ;;  %v708_v19 = vpop.permute.xlu0 %707 }
 0x323   :  { %1143 = vmatmul.mubr.msk.f32.gmra.mxu0 %vm349_vm11, %v502_v57 }
 0x324   :  { %1153 = vmatprep.mubr.msk.f32.mxu0 %vm721_vm0, %v706_v60 }
 0x3d0   :  { %v1119_v61 = vpop.f32.mrf.mxu1 }
 0x3d2   :  { %v585_v46 = vpop.f32.mrf.mxu1 }
 0x3d4   :  { %v1122_v56 = vpop.f32.mrf.mxu1 }
 0x3d6   :  { %v595_v53 = vpop.f32.mrf.mxu1 }
 0x3df   :  { %v1141_v50 = vpop.f32.mrf.mxu0 }
 0x3e0   :  { %v688_v1 = vadd.f32 %v1141_v50, %v1119_v61 }
 0x3e1   :  { %v682_v51 = vpop.f32.mrf.mxu0 }
 0x3e2   :  { %v683_v4 = vadd.f32 %v682_v51, %v585_v46  ;;  %v702_v16 = vadd.f32 %v688_v1, %v58_v49 }
 0x3e3   :  { %v1144_v62 = vpop.f32.mrf.mxu0 }
 0x3e4   :  { %v698_v63 = vadd.f32 %v1144_v62, %v1122_v56  ;;  %v701_v17 = vadd.f32 %v683_v4, %v58_v49 }
 0x3e5   :  { %v692_v0 = vpop.f32.mrf.mxu0 }
 0x3e6   :  { %v704_v2 = vadd.f32 %v698_v63, %v58_v49  ;;  %v693_v3 = vadd.f32 %v692_v0, %v595_v53 }
 0x3e8   :  { %v703_v13 = vadd.f32 %v693_v3, %v58_v49  ;;  %1145 = vmatprep.subr.mxu0 %v704_v2  ;;  %1165 = vmatprep.subr.mxu1 %v704_v2 }
 0x3e9   :  { %1146 = vmatpush3.msra.mxu0 %v704_v2  ;;  %1169 = vmatpush3.msra.mxu1 %v704_v2 }
 0x3ea   :  { %1147 = vmatprep.subr.mxu0 %v703_v13  ;;  %1166 = vmatprep.subr.mxu1 %v703_v13 }
 0x3eb   :  { %1148 = vmatpush3.msra.mxu0 %v703_v13  ;;  %1170 = vmatpush3.msra.mxu1 %v703_v13 }
 0x3ec   :  { %1149 = vmatprep.subr.mxu0 %v702_v16  ;;  %1167 = vmatprep.subr.mxu1 %v702_v16 }
 0x3ed   :  { %1150 = vmatpush3.msra.mxu0 %v702_v16  ;;  %1171 = vmatpush3.msra.mxu1 %v702_v16 }
 0x3ee   :  { %1151 = vmatprep.subr.mxu0 %v701_v17  ;;  %1168 = vmatprep.subr.mxu1 %v701_v17 }
 0x3ef   :  { %1152 = vmatpush3.msra.mxu0 %v701_v17  ;;  %1172 = vmatpush3.msra.mxu1 %v701_v17 }
 0x3f0   :  { %1154 = vmatmul.mubr.msk.f32.vlgmr.msra.gmra.mxu0 %vm721_vm0, %v708_v19  ;;  %1157 = vmatmul.mubr.msk.f32.vlgmr.msra.gmra.mxu1 %vm721_vm0, %v712_v55 }
 0x3f1   :  { %1159 = vmatprep.mubr.msk.f32.mxu1 %vm721_vm0, %v714_v59 }
 0x3f4   :  { %1160 = vmatmul.mubr.msk.f32.gmra.mxu1 %vm721_vm0, %v716_v14 }
 0x3f5   :  { %1162 = vmatprep.mubr.msk.f32.mxu1 %vm721_vm0, %v718_v22 }
 0x3f8   :  { %1163 = vmatmul.mubr.msk.f32.gmra.mxu1 %vm721_vm0, %v720_v23 }
 0x4b0   :  { %v1155_v26 = vpop.f32.mrf.mxu0  ;;  %v1158_v27 = vpop.f32.mrf.mxu1 }
 0x4b1   :  { %v844_v29 = vmax.f32 %v1155_v26, 1.0  ;;  %v846_v20 = vmax.f32 %v1158_v27, 1.0 }
 0x4b2   :  { %v804_v7 = vpop.f32.mrf.mxu0  ;;  %v814_v8 = vpop.f32.mrf.mxu1 }
 0x4b3   :  { %1218 = vrcp.f32 %v844_v29  ;;  %v843_v9 = vmax.f32 %v804_v7, 1.0  ;;  %v845_v24 = vmax.f32 %v814_v8, 1.0 }
 0x4b4   :  { %v1161_v10 = vpop.f32.mrf.mxu1 }
 0x4b5   :  { %1220 = vrcp.f32 %v843_v9  ;;  %v848_v11 = vmax.f32 %v1161_v10, 1.0 }
 0x4b6   :  { %v824_v5 = vpop.f32.mrf.mxu1  ;;  %1222 = vrcp.f32 %v846_v20 }
 0x4b7   :  { %v847_v6 = vmax.f32 %v824_v5, 1.0  ;;  %1224 = vrcp.f32 %v845_v24 }
 0x4b8   :  { %v1164_v37 = vpop.f32.mrf.mxu1  ;;  %1226 = vrcp.f32 %v848_v11 }
 0x4b9   :  { %v850_v12 = vmax.f32 %v1164_v37, 1.0  ;;  %1228 = vrcp.f32 %v847_v6 }
 0x4ba   :  { %v834_v38 = vpop.f32.mrf.mxu1 }
 0x4bb   :  { %1230 = vrcp.f32 %v850_v12  ;;  %v849_v44 = vmax.f32 %v834_v38, 1.0 }
 0x4bd   :  { %1232 = vrcp.f32 %v849_v44 }
 0x4c0   :  { %v1219_v39 = vpop.eup %1218 }
 0x4c1   :  { %866 = vperm.xlu1 %1185, %v1219_v39  }
 0x4c2   :  { %v1221_v35 = vpop.eup %1220 }
 0x4c3   :  { %861 = vperm.xlu0 %1184, %v1221_v35   ;;  %v1223_v40 = vpop.eup %1222 }
 0x4c4   :  { %v1225_v42 = vpop.eup %1224 }
 0x4c5   :  { %876 = vperm.xlu1 %1185, %v1223_v40   ;;  %v1227_v28 = vpop.eup %1226 }
 0x4c6   :  { %v1229_v43 = vpop.eup %1228 }
 0x4c7   :  { %871 = vperm.xlu0 %1184, %v1225_v42  }
 0x4c8   :  { %v1231_v45 = vpop.eup %1230 }
 0x4c9   :  { %886 = vperm.xlu1 %1185, %v1227_v28  }
 0x4ca   :  { %v1233_v25 = vpop.eup %1232 }
 0x4cb   :  { %881 = vperm.xlu0 %1184, %v1229_v43  }
 0x4cd   :  { %896 = vperm.xlu1 %1185, %v1231_v45  }
 0x4cf   :  { %891 = vperm.xlu0 %1184, %v1233_v25  }
 0x53c   :  { %v867_v47 = vpop.permute.xlu1 %866 }
 0x53d   :  { %v900_v21 = vmul.f32 %v1155_v26, %v867_v47 }
 0x53e   :  { %v862_v18 = vpop.permute.xlu0 %861 }
 0x53f   :  { %v916_v48 = vmin.f32 %v900_v21, 0.0  ;;  %v899_v54 = vmul.f32 %v862_v18, %v804_v7  ;;  %vm908_vm1 = vcmp.gt.f32.partialorder %v900_v21, 0.0 }
 0x540   :  { %v877_v15 = vpop.permute.xlu1 %876 }
 0x541   :  { %v925_v57 = vmul.f32 1.442695, %v916_v48  ;;  %v915_v58 = vmin.f32 %v899_v54, 0.0  ;;  %v902_v59 = vmul.f32 %v1158_v27, %v877_v15  ;;  %vm907_vm2 = vcmp.gt.f32.partialorder %v899_v54, 0.0 }
 0x542   :  { %v872_v60 = vpop.permute.xlu0 %871 }
 0x543   :  { %1234 = vpow2.f32 %v925_v57  ;;  %v923_v61 = vmul.f32 1.442695, %v915_v58  ;;  %v918_v46 = vmin.f32 %v902_v59, 0.0  ;;  %v901_v50 = vmul.f32 %v872_v60, %v814_v8 }
 0x544   :  { %v887_v51 = vpop.permute.xlu1 %886  ;;  %vm910_vm3 = vcmp.gt.f32.partialorder %v902_v59, 0.0 }
 0x545   :  { %1236 = vpow2.f32 %v923_v61  ;;  %v929_v56 = vmul.f32 1.442695, %v918_v46  ;;  %v904_v62 = vmul.f32 %v1161_v10, %v887_v51  ;;  %v917_v55 = vmin.f32 %v901_v50, 0.0 }
 0x546   :  { %v882_v63 = vpop.permute.xlu0 %881  ;;  %vm909_vm4 = vcmp.gt.f32.partialorder %v901_v50, 0.0 }
 0x547   :  { %1238 = vpow2.f32 %v929_v56  ;;  %v920_v49 = vmin.f32 %v904_v62, 0.0  ;;  %v903_v53 = vmul.f32 %v882_v63, %v824_v5  ;;  %v927_v0 = vmul.f32 1.442695, %v917_v55 }
 0x548   :  { %v897_v1 = vpop.permute.xlu1 %896  ;;  %vm912_vm5 = vcmp.gt.f32.partialorder %v904_v62, 0.0 }
 0x549   :  { %v933_v2 = vmul.f32 1.442695, %v920_v49  ;;  %v919_v3 = vmin.f32 %v903_v53, 0.0  ;;  %v906_v4 = vmul.f32 %v1164_v37, %v897_v1  ;;  %1240 = vpow2.f32 %v927_v0 }
 0x54a   :  { %v892_v13 = vpop.permute.xlu0 %891  ;;  %vm911_vm6 = vcmp.gt.f32.partialorder %v903_v53, 0.0 }
 0x54b   :  { %1242 = vpow2.f32 %v933_v2  ;;  %v931_v14 = vmul.f32 1.442695, %v919_v3  ;;  %v922_v16 = vmin.f32 %v906_v4, 0.0  ;;  %v905_v17 = vmul.f32 %v892_v13, %v834_v38 }
 0x54c   :  { %vm914_vm7 = vcmp.gt.f32.partialorder %v906_v4, 0.0 }
 0x54d   :  { %1244 = vpow2.f32 %v931_v14  ;;  %v937_v19 = vmul.f32 1.442695, %v922_v16  ;;  %v921_v22 = vmin.f32 %v905_v17, 0.0  ;;  %vm913_vm8 = vcmp.gt.f32.partialorder %v905_v17, 0.0 }
 0x54f   :  { %1246 = vpow2.f32 %v937_v19  ;;  %v935_v26 = vmul.f32 1.442695, %v921_v22 }
 0x550   :  { %v1235_v23 = vpop.eup %1234 }
 0x551   :  { %v1024_v27 = vadd.f32 -1.0, %v1235_v23  ;;  %1248 = vpow2.f32 %v935_v26 }
 0x552   :  { %v1237_v29 = vpop.eup %1236 }
 0x553   :  { %v948_v7 = vsel %vm908_vm1, %v900_v21, %v1024_v27  ;;  %v1023_v8 = vadd.f32 -1.0, %v1237_v29 }
 0x554   :  { %v1239_v20 = vpop.eup %1238  ;;  %v956_v9 = vadd.f32 %v948_v7, %v1398_v31 }
 0x555   :  { %v947_v10 = vsel %vm907_vm2, %v899_v54, %v1023_v8  ;;  %v1026_v24 = vadd.f32 -1.0, %v1239_v20 }
 0x556   :  { %964 = vst.msk [vmem:[#allocation7 + $0x8] sm:$0xff] %vm349_vm11, %v956_v9  ;;  %v955_v5 = vadd.f32 %v947_v10, %v1396_v30  ;;  %v1241_v11 = vpop.eup %1240 }
 0x557   :  { %v950_v6 = vsel %vm910_vm3, %v902_v59, %v1026_v24  ;;  %v1025_v38 = vadd.f32 -1.0, %v1241_v11 }
 0x558   :  { %v1243_v37 = vpop.eup %1242  ;;  %963 = vst.msk [vmem:[#allocation7] sm:$0xff] %vm349_vm11, %v955_v5  ;;  %v958_v12 = vadd.f32 %v950_v6, %v1408_v36 }
 0x559   :  { %v1028_v44 = vadd.f32 -1.0, %v1243_v37  ;;  %v949_v31 = vsel %vm909_vm4, %v901_v50, %v1025_v38 }
 0x55a   :  { %v1245_v39 = vpop.eup %1244  ;;  %966 = vst.msk [vmem:[#allocation7 + $0x18] sm:$0xff] %vm349_vm11, %v958_v12  ;;  %v957_v35 = vadd.f32 %v949_v31, %v1404_v34 }
 0x55b   :  { %v952_v40 = vsel %vm912_vm5, %v904_v62, %v1028_v44  ;;  %v1027_v30 = vadd.f32 -1.0, %v1245_v39 }
 0x55c   :  { %v1247_v42 = vpop.eup %1246  ;;  %v960_v28 = vadd.f32 %v952_v40, %v1402_v33  ;;  %965 = vst.msk [vmem:[#allocation7 + $0x10] sm:$0xff] %vm349_vm11, %v957_v35 }
 0x55d   :  { %v951_v43 = vsel %vm911_vm6, %v903_v53, %v1027_v30  ;;  %v1030_v36 = vadd.f32 -1.0, %v1247_v42 }
 0x55e   :  { %968 = vst.msk [vmem:[#allocation7 + $0x28] sm:$0xff] %vm349_vm11, %v960_v28  ;;  %v959_v45 = vadd.f32 %v951_v43, %v1400_v32  ;;  %v1249_v25 = vpop.eup %1248 }
 0x55f   :  { %v954_v47 = vsel %vm914_vm7, %v906_v4, %v1030_v36  ;;  %v1029_v21 = vadd.f32 -1.0, %v1249_v25 }
 0x560   :  { %967 = vst.msk [vmem:[#allocation7 + $0x20] sm:$0xff] %vm349_vm11, %v959_v45  ;;  %v962_v34 = vadd.f32 %v954_v47, %v1432_v52 }
 0x561   :  { %v953_v33 = vsel %vm913_vm8, %v905_v17, %v1029_v21 }
 0x562   :  { %970 = vst.msk [vmem:[#allocation7 + $0x38] sm:$0xff] %vm349_vm11, %v962_v34  ;;  %v961_v18 = vadd.f32 %v953_v33, %v1415_v41 }
 0x564   :  { %969 = vst.msk [vmem:[#allocation7 + $0x30] sm:$0xff] %vm349_vm11, %v961_v18 }
 0x565   :  { %1301 = shalt.err (!%p1298_p0)
}
 0x566   :  { %s1325_s24 = smov 128   ;;  %s1326_s25 = smov 8  }
 0x567   :  { %982 = dma.vmem_to_hbm [thread:$0]  %s977_s22, 1024, %s1528_s2, [#allocation4], %s1325_s24, %s1325_s24, %s1326_s25  }
 0x568   :  { %1314 = dma.done.wait [#allocation4], 1024  }
 0x569   :  { %1315 = vsyncadd [#allocation4], 4294966272 }
 0x56a   :  { %986 = vsyncpa [#allocation3], 1 }
 0x56b   :  { %987 = vsyncpa [#allocation6], 1 }
 0x56c   :  { %988 = vsyncpa [#allocation4], 1 }

</bundles_post_ra>
